<compile_context>
chip_gen: v6e
topology: v6e:2x2x1
jax: 0.10.0
libtpu: 0.0.40
codegen_flags: <defaults>
</compile_context>

<pallas_src>
from functools import partial

import jax
import jax.numpy as jnp
from jax.experimental import pallas as pl
from jax.experimental.pallas import tpu as pltpu


def mlp_kernel(x_ref, w1_ref, b1_ref, w2_ref, b2_ref, o_ref):
    # Hidden layer: relu(X @ W1 + b1). bf16 operands, f32 accumulate, f32 bias+relu.
    h = jnp.dot(x_ref[...], w1_ref[...], preferred_element_type=jnp.float32)
    h = jnp.maximum(h + b1_ref[...], 0.0)            # b1 is (1, hid_pad) -> broadcasts
    # (the module's second relu is idempotent -> omitted, semantics identical)

    # Output layer: relu(h @ W2 + b2). Cast h back to bf16 for the MXU.
    out = jnp.dot(h.astype(w2_ref.dtype), w2_ref[...],
                  preferred_element_type=jnp.float32)
    o_ref[...] = jnp.maximum(out + b2_ref[...], 0.0).astype(o_ref.dtype)


def prepare_mlp_params(w1, b1, w2, b2, *, compute_dtype=jnp.bfloat16):
    """One-time parameter prep: lane-pad hidden/output dims to 128 and cast to bf16.

    Zero padding is exact: padded h columns are relu(0 + 0) = 0 and padded W2 rows
    contribute nothing; padded output columns are sliced off after the kernel.
    """
    in_dim, hid_dim = w1.shape
    hid2, out_dim = w2.shape
    assert hid2 == hid_dim
    hid_pad = pl.cdiv(hid_dim, 128) * 128
    out_pad = pl.cdiv(out_dim, 128) * 128

    w1_p = jnp.zeros((in_dim, hid_pad), compute_dtype).at[:, :hid_dim].set(
        w1.astype(compute_dtype))
    b1_p = jnp.zeros((1, hid_pad), jnp.float32).at[:, :hid_dim].set(
        b1.reshape(1, -1).astype(jnp.float32))
    w2_p = jnp.zeros((hid_pad, out_pad), compute_dtype).at[:hid_dim, :out_dim].set(
        w2.astype(compute_dtype))
    b2_p = jnp.zeros((1, out_pad), jnp.float32).at[:, :out_dim].set(
        b2.reshape(1, -1).astype(jnp.float32))
    return w1_p, b1_p, w2_p, b2_p


@partial(jax.jit, static_argnames=("out_dim", "tm_max"))
def mlp_forward(x, w1_p, b1_p, w2_p, b2_p, *, out_dim, tm_max=2048):
    batch, in_dim = x.shape
    hid_pad = w1_p.shape[1]
    out_pad = w2_p.shape[1]

    # --- batch tiling: aim for >= 2 grid steps (dual-TC v7x) when batch allows,
    #     tile a multiple of 8 sublanes, capped at tm_max ---
    half = pl.cdiv(batch, 2)
    tm = min(tm_max, max(8, ((half + 7) // 8) * 8))
    bp = pl.cdiv(batch, tm) * tm
    grid = (bp // tm,)

    # --- stream X as bf16; only pad the batch if the tile doesn't divide it ---
    x_p = x.astype(w1_p.dtype)
    if bp != batch:
        x_p = jnp.pad(x_p, ((0, bp - batch), (0, 0)))

    op_bytes = jnp.dtype(w1_p.dtype).itemsize   # bf16 operands
    f32_bytes = 4
    cost = pl.CostEstimate(
        flops=2 * bp * (in_dim * hid_pad + hid_pad * out_pad),
        transcendentals=0,
        bytes_accessed=(
            bp * in_dim * op_bytes          # x
            + in_dim * hid_pad * op_bytes   # w1
            + hid_pad * f32_bytes           # b1
            + hid_pad * out_pad * op_bytes  # w2
            + out_pad * f32_bytes           # b2
            + bp * out_pad * f32_bytes      # out
        ),
    )

    out_padded = pl.pallas_call(
        mlp_kernel,
        out_shape=jax.ShapeDtypeStruct((bp, out_pad), jnp.float32),
        grid=grid,
        in_specs=[
            # X: pipelined batch tiles (double-buffered by the Pallas pipeline)
            pl.BlockSpec((tm, in_dim), lambda i: (i, 0)),
            # Weights / biases: full-array blocks with constant index_maps ->
            # DMA'd once, VMEM-resident across all grid steps
            pl.BlockSpec((in_dim, hid_pad), lambda i: (0, 0)),
            pl.BlockSpec((1, hid_pad), lambda i: (0, 0)),
            pl.BlockSpec((hid_pad, out_pad), lambda i: (0, 0)),
            pl.BlockSpec((1, out_pad), lambda i: (0, 0)),
        ],
        out_specs=pl.BlockSpec((tm, out_pad), lambda i: (i, 0)),
        compiler_params=pltpu.CompilerParams(
            dimension_semantics=("parallel",),
        ),
        cost_estimate=cost,
    )(x_p, w1_p, b1_p, w2_p, b2_p)

    # Strip batch / lane padding (fuses inside this jit; padded rows are discarded,
    # note they are NOT zero in general).
    return out_padded[:batch, :out_dim]


def reference_forward(x, w1, b1, w2, b2):
    h = jnp.maximum(x @ w1 + b1, 0.0)
    h = jnp.maximum(h, 0.0)
    return jnp.maximum(h @ w2 + b2, 0.0)


if __name__ == "__main__":
    key = jax.random.PRNGKey(0)
    k_x, k_w1, k_w2 = jax.random.split(key, 3)

    batch, in_dim, hid_dim, out_dim = 2, 20, 64, 10

    # Deterministic parameter init mirroring the module's __init__:
    # weights ~ N(0, 1), biases zero.
    x = jax.random.normal(k_x, (batch, in_dim), dtype=jnp.float32)
    w1 = jax.random.normal(k_w1, (in_dim, hid_dim), dtype=jnp.float32)
    b1 = jnp.zeros((hid_dim,), dtype=jnp.float32)
    w2 = jax.random.normal(k_w2, (hid_dim, out_dim), dtype=jnp.float32)
    b2 = jnp.zeros((out_dim,), dtype=jnp.float32)

    # One-time parameter prep (pad + bf16 cast) outside the per-call path.
    w1_p, b1_p, w2_p, b2_p = prepare_mlp_params(w1, b1, w2, b2)

    out = mlp_forward(x, w1_p, b1_p, w2_p, b2_p, out_dim=out_dim)
    out = jax.block_until_ready(out)

    ref = reference_forward(x, w1, b1, w2, b2)
    assert out.shape == (batch, out_dim)
    # bf16 MXU operands with f32 accumulation -> loosened tolerance vs f32 reference.
    assert jnp.allclose(out, ref, rtol=3e-2, atol=5e-1), float(
        jnp.max(jnp.abs(out - ref)))

    print("KERNEL_OK")
</pallas_src>

<mosaic_0001>
module attributes {stable_mosaic.version = 11 : i64} {
  func.func @mlp_kernel(%arg0: i32, %arg1: memref<8x20xbf16, #tpu.memory_space<vmem>>, %arg2: memref<20x128xbf16, #tpu.memory_space<vmem>>, %arg3: memref<1x128xf32, #tpu.memory_space<vmem>>, %arg4: memref<128x128xbf16, #tpu.memory_space<vmem>>, %arg5: memref<1x128xf32, #tpu.memory_space<vmem>>, %arg6: memref<8x128xf32, #tpu.memory_space<vmem>>) attributes {dimension_semantics = [#tpu.dimension_semantics<parallel>], iteration_bounds = array<i64: 1>, scalar_prefetch = 0 : i64, scratch_operands = 0 : i64, tpu.core_type = #tpu.core_type<tc>, window_params = [{transform_indices = @transform_0, window_bounds = array<i64: 8, 20>}, {pipeline_mode = #tpu.pipeline_mode<synchronous>, transform_indices = @transform_1, window_bounds = array<i64: 20, 128>}, {pipeline_mode = #tpu.pipeline_mode<synchronous>, transform_indices = @transform_2, window_bounds = array<i64: 1, 128>}, {pipeline_mode = #tpu.pipeline_mode<synchronous>, transform_indices = @transform_3, window_bounds = array<i64: 128, 128>}, {pipeline_mode = #tpu.pipeline_mode<synchronous>, transform_indices = @transform_4, window_bounds = array<i64: 1, 128>}, {transform_indices = @transform_5, window_bounds = array<i64: 8, 128>}]} {
    %c0 = arith.constant 0 : index
    %c0_0 = arith.constant 0 : index
    %0 = vector.load %arg1[%c0, %c0_0] : memref<8x20xbf16, #tpu.memory_space<vmem>>, vector<8x20xbf16>
    %c0_1 = arith.constant 0 : index
    %c0_2 = arith.constant 0 : index
    %1 = vector.load %arg2[%c0_1, %c0_2] : memref<20x128xbf16, #tpu.memory_space<vmem>>, vector<20x128xbf16>
    %cst = arith.constant dense<0.000000e+00> : vector<8x128xf32>
    %2 = tpu.matmul %0, %1, %cst {dimension_numbers = #tpu.dot_dimension_numbers<[1], [0], [0], [1], [0, 0, 1, 1], [], []>} : vector<8x20xbf16>, vector<20x128xbf16>, vector<8x128xf32> -> vector<8x128xf32>
    %c0_3 = arith.constant 0 : index
    %c0_4 = arith.constant 0 : index
    %3 = vector.load %arg3[%c0_3, %c0_4] : memref<1x128xf32, #tpu.memory_space<vmem>>, vector<1x128xf32>
    %4 = vector.broadcast %3 : vector<1x128xf32> to vector<8x128xf32>
    %5 = arith.addf %2, %4 : vector<8x128xf32>
    %cst_5 = arith.constant 0.000000e+00 : f32
    %6 = vector.broadcast %cst_5 : f32 to vector<8x128xf32>
    %7 = arith.maximumf %5, %6 : vector<8x128xf32>
    %8 = arith.truncf %7 : vector<8x128xf32> to vector<8x128xbf16>
    %c0_6 = arith.constant 0 : index
    %c0_7 = arith.constant 0 : index
    %9 = vector.load %arg4[%c0_6, %c0_7] : memref<128x128xbf16, #tpu.memory_space<vmem>>, vector<128x128xbf16>
    %cst_8 = arith.constant dense<0.000000e+00> : vector<8x128xf32>
    %10 = tpu.matmul %8, %9, %cst_8 {dimension_numbers = #tpu.dot_dimension_numbers<[1], [0], [0], [1], [0, 0, 1, 1], [], []>} : vector<8x128xbf16>, vector<128x128xbf16>, vector<8x128xf32> -> vector<8x128xf32>
    %c0_9 = arith.constant 0 : index
    %c0_10 = arith.constant 0 : index
    %11 = vector.load %arg5[%c0_9, %c0_10] : memref<1x128xf32, #tpu.memory_space<vmem>>, vector<1x128xf32>
    %12 = vector.broadcast %11 : vector<1x128xf32> to vector<8x128xf32>
    %13 = arith.addf %10, %12 : vector<8x128xf32>
    %cst_11 = arith.constant 0.000000e+00 : f32
    %14 = vector.broadcast %cst_11 : f32 to vector<8x128xf32>
    %15 = arith.maximumf %13, %14 : vector<8x128xf32>
    %c0_12 = arith.constant 0 : index
    %c0_13 = arith.constant 0 : index
    %16 = vector.load %arg6[%c0_12, %c0_13] : memref<8x128xf32, #tpu.memory_space<vmem>>, vector<8x128xf32>
    tpu.vector_store %arg6[%c0_12, %c0_13], %15 {strides = array<i32>} : memref<8x128xf32, #tpu.memory_space<vmem>>, vector<8x128xf32>,
    return
  }
  func.func @transform_0(%arg0: i32) -> (i32, i32) {
    %c0_i32 = arith.constant 0 : i32
    %c0_i32_0 = arith.constant 0 : i32
    return %arg0, %c0_i32 : i32, i32
  }
  func.func @transform_1(%arg0: i32) -> (i32, i32) {
    %c0_i32 = arith.constant 0 : i32
    %c0_i32_0 = arith.constant 0 : i32
    %c0_i32_1 = arith.constant 0 : i32
    return %c0_i32, %c0_i32_0 : i32, i32
  }
  func.func @transform_2(%arg0: i32) -> (i32, i32) {
    %c0_i32 = arith.constant 0 : i32
    %c0_i32_0 = arith.constant 0 : i32
    %c0_i32_1 = arith.constant 0 : i32
    return %c0_i32, %c0_i32_0 : i32, i32
  }
  func.func @transform_3(%arg0: i32) -> (i32, i32) {
    %c0_i32 = arith.constant 0 : i32
    %c0_i32_0 = arith.constant 0 : i32
    %c0_i32_1 = arith.constant 0 : i32
    return %c0_i32, %c0_i32_0 : i32, i32
  }
  func.func @transform_4(%arg0: i32) -> (i32, i32) {
    %c0_i32 = arith.constant 0 : i32
    %c0_i32_0 = arith.constant 0 : i32
    %c0_i32_1 = arith.constant 0 : i32
    return %c0_i32, %c0_i32_0 : i32, i32
  }
  func.func @transform_5(%arg0: i32) -> (i32, i32) {
    %c0_i32 = arith.constant 0 : i32
    %c0_i32_0 = arith.constant 0 : i32
    return %arg0, %c0_i32 : i32, i32
  }
}

</mosaic_0001>

<bundles_post_ra>
// kernel: mlp_forward.1
= control target key start
LH: loop header
LB: loop body
LE: loop exit
PB: predicated region body
PF: predicated region fallthrough
CT: control target
= control target key end

     0   :  { %10 = vsyncpa [#allocation3], 0  ;;  %s405_s0 = inlined_call_operand.vmem [shape: bf16[8,20], index: 0, kind: input, shape index: {}]   ;;  %s406_s1 = inlined_call_operand.hbm [shape: bf16[20,128], index: 1, kind: input, shape index: {}]   ;;  %s407_s2 = inlined_call_operand.vmem [shape: f32[1,128], index: 2, kind: input, shape index: {}]   ;;  %s408_s3 = inlined_call_operand.hbm [shape: bf16[128,128], index: 3, kind: input, shape index: {}]   ;;  %s409_s4 = inlined_call_operand.vmem [shape: f32[1,128], index: 4, kind: input, shape index: {}]   ;;  %s410_s5 = inlined_call_operand.vmem [shape: f32[8,128], index: 5, kind: output, shape index: {}]  }
   0x1   :  { %11 = vsyncpa [#allocation5], 0  ;;  %s351_s18 = smov [#allocation2]  }
   0x2   :  { %s19_s19 = sshll.u32 %s351_s18, 4  ;;  %s20_s19 = int_to_ptr.vmem [resolvable:$true] %s19_s19 }
   0x3   :  { %s315_s20 = scalar_lea.vmem %s20_s19, 192  ;;  %p320_p1 = scmp.lt.s32.totalorder %s20_s19, %s20_s19 }
   0x4   :  { %p316_p0 = scmp.ne.s32.totalorder %s20_s19, %s315_s20  ;;  %p321_p2 = scmp.lt.s32.totalorder %s315_s20, %s315_s20 }
   0x6   :  { %p322_p3 = por %p321_p2, %p320_p1 }
   0x8   :  { %p323_p4 = pnand %p322_p3, %p316_p0 }
   0xa   :  { %326 = shalt.err (!%p323_p4)
}
   0xb   :  { %s352_s21 = smov 64   ;;  %s353_s22 = smov 4  }
   0xc   :  { %25 = dma.hbm_to_vmem [thread:$0]  %s406_s1, 192, %s20_s19, [#allocation3], %s352_s21, %s352_s21, %s353_s22  }
   0xd   :  { %s354_s25 = smov [#allocation4]  }
   0xe   :  { %s33_s26 = sshll.u32 %s354_s25, 4  ;;  %s34_s26 = int_to_ptr.vmem [resolvable:$true] %s33_s26 }
   0xf   :  { %s335_s27 = scalar_lea.vmem %s34_s26, 1024  ;;  %p340_p6 = scmp.lt.s32.totalorder %s34_s26, %s34_s26 }
  0x10   :  { %p336_p5 = scmp.ne.s32.totalorder %s34_s26, %s335_s27  ;;  %p341_p7 = scmp.lt.s32.totalorder %s335_s27, %s335_s27 }
  0x12   :  { %p342_p8 = por %p341_p7, %p340_p6 }
  0x14   :  { %p343_p9 = pnand %p342_p8, %p336_p5 }
  0x16   :  { %346 = shalt.err (!%p343_p9)
}
  0x17   :  { %39 = dma.hbm_to_vmem [thread:$0]  %s408_s3, 1024, %s34_s26, [#allocation5], %s352_s21, %s352_s21, %s353_s22  }
  0x18   :  { %347 = dma.done.wait [#allocation3], 192  }
  0x19   :  { %348 = vsyncadd [#allocation3], 4294967104 }
  0x1a   :  { %349 = dma.done.wait [#allocation5], 1024  }
  0x1b   :  { %350 = vsyncadd [#allocation5], 4294966272  ;;  %v355_v0 = vmov 0.0   ;;  %vm356_vm0 = vmmov 0   ;;  %vm73_vm1 = vcmask 1041408   ;;  %v299_v3 = vld [vmem:[#allocation4 + $0x38] sm:$0xff]  }
  0x1c   :  { %263 = vmatprep.subr.bf16.mxu0 %v355_v0  ;;  %267 = vmatprep.mubr.msk.bf16.mxu0 %vm356_vm0, %v355_v0  ;;  %v297_v1 = vld [vmem:[#allocation2 + $0x8] ss:$0 sps:$4 sm:$0x33]   ;;  %v298_v4 = vld [vmem:[#allocation2] sm:$0xff]   ;;  %vm69_vm2 = vcmask 162816   ;;  %v301_v7 = vld [vmem:[#allocation4 + $0x28] sm:$0xff]  }
  0x1d   :  { %271 = vmatprep.subr.bf16.mxu1 %v355_v0  ;;  %287 = vmatprep.mubr.msk.bf16.mxu1 %vm356_vm0, %v355_v0  ;;  %v75_v2 = vsel %vm73_vm1, %v297_v1, 0  ;;  %v300_v5 = vld [vmem:[#allocation4 + $0x30] sm:$0xff]   ;;  %v302_v8 = vld [vmem:[#allocation4 + $0x20] sm:$0xff]   ;;  %v303_v9 = vld [vmem:[#allocation4 + $0x18] sm:$0xff]  }
  0x1e   :  { %264 = vmatpush3.bf16.msra.mxu0 %v75_v2  ;;  %272 = vmatpush3.bf16.msra.mxu1 %v299_v3  ;;  %v49_v6 = vld [vmem:[%s405_s0] sm:$0xf]  ;;  %v305_v11 = vld [vmem:[#allocation4 + $0x8] sm:$0xff]   ;;  %v306_v12 = vld [vmem:[#allocation4] sm:$0xff]  }
  0x1f   :  { %265 = vmatprep.subr.bf16.mxu0 %v355_v0  ;;  %273 = vmatprep.subr.bf16.mxu1 %v355_v0  ;;  %v304_v10 = vld [vmem:[#allocation4 + $0x10] sm:$0xff]  }
  0x20   :  { %v238_v13 = vld [vmem:[%s407_s2] ss:$0 sm:$0xff] }
  0x21   :  { %v242_v21 = vld [vmem:[%s409_s4] ss:$0 sm:$0xff] }
  0x22   :  { %266 = vmatpush3.bf16.msra.mxu0 %v298_v4  ;;  %274 = vmatpush3.bf16.msra.mxu1 %v300_v5 }
  0x23   :  { %275 = vmatprep.subr.bf16.mxu1 %v355_v0 }
  0x25   :  { %268 = vmatmul.mubr.msk.bf16.vlgmr.msra.gmra.mxu0 %vm69_vm2, %v49_v6 }
  0x26   :  { %276 = vmatpush3.bf16.msra.mxu1 %v301_v7 }
  0x27   :  { %277 = vmatprep.subr.bf16.mxu1 %v355_v0 }
  0x2a   :  { %278 = vmatpush3.bf16.msra.mxu1 %v302_v8 }
  0x2b   :  { %279 = vmatprep.subr.bf16.mxu1 %v355_v0 }
  0x2e   :  { %280 = vmatpush3.bf16.msra.mxu1 %v303_v9 }
  0x2f   :  { %281 = vmatprep.subr.bf16.mxu1 %v355_v0 }
  0x32   :  { %282 = vmatpush3.bf16.msra.mxu1 %v304_v10 }
  0x33   :  { %283 = vmatprep.subr.bf16.mxu1 %v355_v0 }
  0x36   :  { %284 = vmatpush3.bf16.msra.mxu1 %v305_v11 }
  0x37   :  { %285 = vmatprep.subr.bf16.mxu1 %v355_v0 }
  0x3a   :  { %286 = vmatpush3.bf16.msra.mxu1 %v306_v12 }
  0xe5   :  { %v111_v14 = vpop.f32.mrf.mxu0 }
  0xe6   :  { %v112_v15 = vadd.f32 %v238_v13, %v111_v14 }
  0xe7   :  { %v269_v16 = vpop.f32.mrf.mxu0 }
  0xe8   :  { %v117_v17 = vmax.f32 %v112_v15, 0.0 }
  0xe9   :  { %v114_v18 = vpop.f32.mrf.mxu0 }
  0xea   :  { %v118_v19 = vpack.c.bf16 %v117_v17, %v117_v17 }
  0xeb   :  { %v270_v20 = vpop.f32.mrf.mxu0 }
  0xec   :  { %288 = vmatmul.mubr.bf16.vlgmr.msra.gmra.mxu1 %v118_v19 }
 0x1ac   :  { %v224_v22 = vpop.f32.mrf.mxu1 }
 0x1ad   :  { %v225_v23 = vadd.f32 %v242_v21, %v224_v22 }
 0x1ae   :  { %v289_v24 = vpop.f32.mrf.mxu1 }
 0x1af   :  { %v230_v25 = vmax.f32 %v225_v23, 0.0 }
 0x1b0   :  { %v227_v26 = vpop.f32.mrf.mxu1 }
 0x1b1   :  { %231 = vst [vmem:[%s410_s5] sm:$0xff] %v230_v25 }
 0x1b2   :  { %v290_v27 = vpop.f32.mrf.mxu1 }
 0x1b3   :  { %236 = vsyncpa [#allocation3], 1 }
 0x1b4   :  { %237 = vsyncpa [#allocation5], 1 }

</bundles_post_ra>
